<compile_context>
chip_gen: v7x
topology: tpu7x:2x2x1
jax: 0.10.0
libtpu: 0.0.40
codegen_flags: <defaults>
</compile_context>

<pallas_src>
import jax
import jax.numpy as jnp
from jax.experimental import pallas as pl
from jax.experimental.pallas import tpu as pltpu

LANES = 384            # 3 * 128: one packed lane-row holds 128 full x-rows
_MIN_TILE_R = 512      # below this many packed rows, use a single full block
_MIB = 1024 * 1024


def _mix3_kernel(x_ref, c_ref, o_ref):
    """Lane-dense 3x3 right-matmul on packed (tile_r, 384) tiles.

    x_ref: (tile_r, 384) packed input tile.
    c_ref: (8, 384) coefficient table; rows 0..4 are shifts d = -2,-1,0,+1,+2
           (rows 5..7 are zero padding for sublane alignment).
    o_ref: (tile_r, 384) packed output tile (same layout as x_ref).
    """
    x = x_ref[...]
    if x.dtype != jnp.float32:
        x = x.astype(jnp.float32)             # accumulate in f32 (accuracy; VPU slack)
    c = c_ref[...]                            # constant block, resident across the grid
    acc = x * c[2:3, :]                                              # d =  0
    acc = acc + pltpu.roll(x, shift=1, axis=1) * c[1:2, :]           # d = -1
    acc = acc + pltpu.roll(x, shift=2, axis=1) * c[0:1, :]           # d = -2
    acc = acc + pltpu.roll(x, shift=LANES - 1, axis=1) * c[3:4, :]   # d = +1
    acc = acc + pltpu.roll(x, shift=LANES - 2, axis=1) * c[4:5, :]   # d = +2
    o_ref[...] = acc.astype(o_ref.dtype)


def _coeff_vectors(weight: jax.Array) -> jax.Array:
    """Hoisted weight-derived constants: (8, 384) table, C[d+2, l] = w[l%3+d, l%3]."""
    w = weight.astype(jnp.float32)
    col = jnp.arange(LANES, dtype=jnp.int32) % 3
    rows = []
    for d in (-2, -1, 0, 1, 2):
        k = col + d
        valid = (k >= 0) & (k <= 2)
        rows.append(jnp.where(valid, w[jnp.clip(k, 0, 2), col], 0.0))
    c = jnp.stack(rows, axis=0)                                               # (5, 384)
    return jnp.concatenate([c, jnp.zeros((3, LANES), jnp.float32)], axis=0)   # (8, 384)


def _round_up(n: int, m: int) -> int:
    return ((n + m - 1) // m) * m


def _vmem_capacity_bytes() -> int:
    """Best-effort physical VMEM query; conservative (v7x) fallback."""
    try:
        info = pltpu.get_tpu_info()
        for name in ("vmem_capacity_bytes", "vmem_size_bytes", "vmem_bytes"):
            v = getattr(info, name, None)
            if v:
                return int(v)
    except Exception:
        pass
    return 64 * _MIB


def _choose_tiling(num_rows: int, itemsize_in: int, itemsize_out: int):
    """Pick (tile_rows, vmem_limit_bytes) for a (num_rows, 384) slab."""
    if num_rows <= _MIN_TILE_R:
        return num_rows, 32 * _MIB                     # single full-extent block
    if _vmem_capacity_bytes() >= 100 * _MIB:           # v5e / v6e: 128 MiB physical
        pipeline_budget, vmem_limit = 48 * _MIB, 64 * _MIB
    else:                                              # v7x: 64 MiB per TensorCore
        pipeline_budget, vmem_limit = 24 * _MIB, 32 * _MIB
    # Double-buffered input + output blocks dominate the pipeline footprint.
    bytes_per_row = LANES * (2 * itemsize_in + 2 * itemsize_out)
    cap = max(_MIN_TILE_R, (pipeline_budget // bytes_per_row) // 32 * 32)
    # Keep >= ~4 grid steps so the "parallel" axis can shard over v7x's 2 TCs.
    target = max(_MIN_TILE_R, _round_up(pl.cdiv(num_rows, 4), 32))
    return min(cap, target), vmem_limit


def _run_packed(x2: jax.Array, coeffs: jax.Array, out_dtype) -> jax.Array:
    """Run the lane-dense kernel on an (R, 384)-shaped slab."""
    R = x2.shape[0]
    tr, vmem_limit = _choose_tiling(R, x2.dtype.itemsize, jnp.dtype(out_dtype).itemsize)
    grid = (pl.cdiv(R, tr),)
    return pl.pallas_call(
        _mix3_kernel,
        out_shape=jax.ShapeDtypeStruct((R, LANES), out_dtype),
        grid=grid,
        in_specs=[
            pl.BlockSpec((tr, LANES), lambda i: (i, 0)),
            pl.BlockSpec((8, LANES), lambda i: (0, 0)),   # constant index -> fetched once
        ],
        out_specs=pl.BlockSpec((tr, LANES), lambda i: (i, 0)),
        compiler_params=pltpu.CompilerParams(
            dimension_semantics=("parallel",),            # shard rows across v7x's 2 TCs
            vmem_limit_bytes=vmem_limit,
        ),
    )(x2, coeffs)


def matmul_with_nn_params(x: jax.Array, weight: jax.Array) -> jax.Array:
    """Equivalent of torch.matmul(x, weight) with weight shape (3, 3)."""
    K, N = weight.shape
    assert K == 3 and N == 3, "module defines a fixed (3, 3) weight"
    assert x.shape[-1] == K, "inner dims must match"
    lead_shape = x.shape[:-1]
    M = 1
    for d in lead_shape:
        M *= d
    out_dtype = jnp.result_type(x.dtype, weight.dtype)
    if M == 0:
        return jnp.zeros((*lead_shape, N), out_dtype)

    coeffs = _coeff_vectors(weight)
    total = M * K

    if total % LANES == 0:
        # Zero-copy fast path (M % 128 == 0): both reshapes are free bitcasts;
        # any partial last grid block is masked by Pallas, so no padding needed.
        x2 = x.reshape(total // LANES, LANES)
        out2 = _run_packed(x2, coeffs, out_dtype)
        return out2.reshape(*lead_shape, N)

    # Ragged tail (M % 128 != 0): pad up to the next full 384-lane row only.
    # TODO(synk): this path still pays one pad + one slice copy of the slab; an
    # in-kernel manual-DMA tail would remove it for large misaligned M.
    R = pl.cdiv(total, LANES)
    padded_total = R * LANES
    x_flat = jnp.pad(x.reshape(total), (0, padded_total - total))
    out2 = _run_packed(x_flat.reshape(R, LANES), coeffs, out_dtype)
    return out2.reshape(padded_total)[:total].reshape(*lead_shape, N)


if __name__ == "__main__":
    key = jax.random.PRNGKey(0)
    kw, kx1, kx2 = jax.random.split(key, 3)

    # Deterministic parameter init matching nn.Parameter(torch.randn(3, 3)).
    weight = jax.random.normal(kw, (3, 3), dtype=jnp.float32)

    # Small batched input (exercises the ragged-tail path: M = 16).
    x_small = jax.random.normal(kx1, (2, 8, 3), dtype=jnp.float32)
    out_small = jax.block_until_ready(matmul_with_nn_params(x_small, weight))
    ref_small = jnp.matmul(x_small, weight, precision=jax.lax.Precision.HIGHEST)
    assert out_small.shape == ref_small.shape
    assert jnp.allclose(out_small, ref_small, atol=1e-5, rtol=1e-5)

    # 128-row-aligned input (exercises the zero-copy fast path: M = 256).
    x_big = jax.random.normal(kx2, (2, 128, 3), dtype=jnp.float32)
    out_big = jax.block_until_ready(matmul_with_nn_params(x_big, weight))
    ref_big = jnp.matmul(x_big, weight, precision=jax.lax.Precision.HIGHEST)
    assert out_big.shape == ref_big.shape
    assert jnp.allclose(out_big, ref_big, atol=1e-5, rtol=1e-5)

    print("KERNEL_OK")
</pallas_src>

<mosaic_0001>
module attributes {stable_mosaic.version = 11 : i64} {
  func.func @_mix3_kernel(%arg0: i32, %arg1: memref<1x384xf32, #tpu.memory_space<vmem>>, %arg2: memref<8x384xf32, #tpu.memory_space<vmem>>, %arg3: memref<1x384xf32, #tpu.memory_space<vmem>>) attributes {dimension_semantics = [#tpu.dimension_semantics<parallel>], iteration_bounds = array<i64: 1>, scalar_prefetch = 0 : i64, scratch_operands = 0 : i64, tpu.core_type = #tpu.core_type<tc>, window_params = [{transform_indices = @transform_0, window_bounds = array<i64: 1, 384>}, {pipeline_mode = #tpu.pipeline_mode<synchronous>, transform_indices = @transform_1, window_bounds = array<i64: 8, 384>}, {transform_indices = @transform_2, window_bounds = array<i64: 1, 384>}]} {
    %c0 = arith.constant 0 : index
    %c0_0 = arith.constant 0 : index
    %0 = vector.load %arg1[%c0, %c0_0] : memref<1x384xf32, #tpu.memory_space<vmem>>, vector<1x384xf32>
    %c0_1 = arith.constant 0 : index
    %c0_2 = arith.constant 0 : index
    %1 = vector.load %arg2[%c0_1, %c0_2] : memref<8x384xf32, #tpu.memory_space<vmem>>, vector<8x384xf32>
    %2 = vector.extract_strided_slice %1 {offsets = [2, 0], sizes = [1, 384], strides = [1, 1]} : vector<8x384xf32> to vector<1x384xf32>
    %3 = arith.mulf %0, %2 : vector<1x384xf32>
    %c1_i32 = arith.constant 1 : i32
    %4 = tpu.dynamic_rotate %0 by %c1_i32 dim 1 : vector<1x384xf32>, i32 -> vector<1x384xf32>
    %5 = vector.extract_strided_slice %1 {offsets = [1, 0], sizes = [1, 384], strides = [1, 1]} : vector<8x384xf32> to vector<1x384xf32>
    %6 = arith.mulf %4, %5 : vector<1x384xf32>
    %7 = arith.addf %3, %6 : vector<1x384xf32>
    %c2_i32 = arith.constant 2 : i32
    %8 = tpu.dynamic_rotate %0 by %c2_i32 dim 1 : vector<1x384xf32>, i32 -> vector<1x384xf32>
    %9 = vector.extract_strided_slice %1 {offsets = [0, 0], sizes = [1, 384], strides = [1, 1]} : vector<8x384xf32> to vector<1x384xf32>
    %10 = arith.mulf %8, %9 : vector<1x384xf32>
    %11 = arith.addf %7, %10 : vector<1x384xf32>
    %c383_i32 = arith.constant 383 : i32
    %12 = tpu.dynamic_rotate %0 by %c383_i32 dim 1 : vector<1x384xf32>, i32 -> vector<1x384xf32>
    %13 = vector.extract_strided_slice %1 {offsets = [3, 0], sizes = [1, 384], strides = [1, 1]} : vector<8x384xf32> to vector<1x384xf32>
    %14 = arith.mulf %12, %13 : vector<1x384xf32>
    %15 = arith.addf %11, %14 : vector<1x384xf32>
    %c382_i32 = arith.constant 382 : i32
    %16 = tpu.dynamic_rotate %0 by %c382_i32 dim 1 : vector<1x384xf32>, i32 -> vector<1x384xf32>
    %17 = vector.extract_strided_slice %1 {offsets = [4, 0], sizes = [1, 384], strides = [1, 1]} : vector<8x384xf32> to vector<1x384xf32>
    %18 = arith.mulf %16, %17 : vector<1x384xf32>
    %19 = arith.addf %15, %18 : vector<1x384xf32>
    %c0_3 = arith.constant 0 : index
    %c0_4 = arith.constant 0 : index
    %20 = vector.load %arg3[%c0_3, %c0_4] : memref<1x384xf32, #tpu.memory_space<vmem>>, vector<1x384xf32>
    tpu.vector_store %arg3[%c0_3, %c0_4], %19 {strides = array<i32>} : memref<1x384xf32, #tpu.memory_space<vmem>>, vector<1x384xf32>,
    return
  }
  func.func @transform_0(%arg0: i32) -> (i32, i32) {
    %c0_i32 = arith.constant 0 : i32
    %c0_i32_0 = arith.constant 0 : i32
    return %arg0, %c0_i32 : i32, i32
  }
  func.func @transform_1(%arg0: i32) -> (i32, i32) {
    %c0_i32 = arith.constant 0 : i32
    %c0_i32_0 = arith.constant 0 : i32
    %c0_i32_1 = arith.constant 0 : i32
    return %c0_i32, %c0_i32_0 : i32, i32
  }
  func.func @transform_2(%arg0: i32) -> (i32, i32) {
    %c0_i32 = arith.constant 0 : i32
    %c0_i32_0 = arith.constant 0 : i32
    return %arg0, %c0_i32 : i32, i32
  }
}

</mosaic_0001>

<bundles_post_ra>
// kernel: tpu_custom_call.1
= control target key start
LH: loop header
LB: loop body
LE: loop exit
PB: predicated region body
PF: predicated region fallthrough
CT: control target
= control target key end

     0   :  { %7 = vsyncpa [#allocation3], 0  ;;  %s474_s0 = inlined_call_operand.hbm [shape: f32[1,384], index: 0, kind: input, shape index: {}]   ;;  %s475_s1 = inlined_call_operand.hbm [shape: f32[8,384], index: 1, kind: input, shape index: {}]   ;;  %s476_s2 = inlined_call_operand.hbm [shape: f32[1,384], index: 2, kind: output, shape index: {}]  }
   0x1   :  { %8 = vsyncpa [#allocation6], 0 }
   0x2   :  { %9 = vsyncpa [#allocation4], 0  ;;  %s371_s9 = smov [#allocation2]   ;;  %s372_s11 = smov [#allocation5]  }
   0x3   :  { %s16_s10 = sshll.u32 %s371_s9, 4  ;;  %s26_s12 = sshll.u32 %s372_s11, 4  ;;  %s17_s10 = int_to_ptr.vmem [resolvable:$true] %s16_s10  ;;  %s27_s12 = int_to_ptr.vmem [resolvable:$true] %s26_s12 }
   0x4   :  { %s299_s15 = scalar_lea.hbm %s474_s0, 48 }
   0x5   :  { %p300_p0 = scmp.ne.s32.totalorder %s474_s0, %s299_s15  ;;  %p303_p1 = scmp.lt.u32.totalorder %s299_s15, %s474_s0 }
   0x7   :  { %p305_p2 = pnand %p303_p1, %p300_p0 }
   0x9   :  { %308 = shalt.err (!%p305_p2)
}
   0xa   :  { %s309_s20 = scalar_lea.vmem %s17_s10, 48  ;;  %s313_s21 = scalar_lea.vmem %s17_s10, 64 }
   0xb   :  { %p310_p3 = scmp.ne.s32.totalorder %s17_s10, %s309_s20  ;;  %p314_p4 = scmp.lt.s32.totalorder %s17_s10, %s17_s10 }
   0xc   :  { %p315_p5 = scmp.lt.s32.totalorder %s313_s21, %s309_s20 }
   0xe   :  { %p316_p6 = por %p315_p5, %p314_p4 }
  0x10   :  { %p317_p7 = pnand %p316_p6, %p310_p3 }
  0x12   :  { %320 = shalt.err (!%p317_p7)
}
  0x13   :  { %19 = dma.hbm_to_vmem [thread:$0]  %s474_s0, 48, %s17_s10, [#allocation3]  }
  0x14   :  { %s321_s26 = scalar_lea.hbm %s475_s1, 384 }
  0x15   :  { %p322_p8 = scmp.ne.s32.totalorder %s475_s1, %s321_s26  ;;  %p325_p9 = scmp.lt.u32.totalorder %s321_s26, %s475_s1 }
  0x17   :  { %p327_p10 = pnand %p325_p9, %p322_p8 }
  0x19   :  { %330 = shalt.err (!%p327_p10)
}
  0x1a   :  { %s331_s3 = scalar_lea.vmem %s27_s12, 384  ;;  %p336_p12 = scmp.lt.s32.totalorder %s27_s12, %s27_s12 }
  0x1b   :  { %p332_p11 = scmp.ne.s32.totalorder %s27_s12, %s331_s3  ;;  %p337_p13 = scmp.lt.s32.totalorder %s331_s3, %s331_s3 }
  0x1d   :  { %p338_p0 = por %p337_p13, %p336_p12 }
  0x1f   :  { %p339_p1 = pnand %p338_p0, %p332_p11 }
  0x21   :  { %342 = shalt.err (!%p339_p1)
}
  0x22   :  { %29 = dma.hbm_to_vmem [thread:$0]  %s475_s1, 384, %s27_s12, [#allocation6]  }
  0x23   :  { %365 = dma.done.wait [#allocation3], 48  }
  0x24   :  { %366 = vsyncadd [#allocation3], 4294967248 }
  0x25   :  { %367 = dma.done.wait [#allocation6], 384  }
  0x26   :  { %368 = vsyncadd [#allocation6], 4294966912  ;;  %v47_v0 = vlaneseq  ;;  %v373_v1 = vmov 1966171168   ;;  %v36_v9 = vld [vmem:[#allocation2] sm:$0x7] }
  0x27   :  { %v45_v2 = vunpack.c.l.s4 %v373_v1  ;;  %v421_v10 = vld [vmem:[#allocation5 + $0x8] sm:$0xff]  ;;  %v423_v13 = vld [vmem:[#allocation5] sm:$0xff]  ;;  %v425_v14 = vld [vmem:[#allocation5 + $0x10] sm:$0xff]  ;;  %s374_s1 = smov 1   ;;  %s375_s5 = smov 2  }
  0x28   :  { %v48_v3 = vshrl.u32 %v47_v0, 7  ;;  %v43_v15 = vcombine.low %v423_v13, %v421_v10  ;;  %s376_s6 = smov 127   ;;  %s377_s7 = smov 126   ;;  %v92_v23 = vand.u32 127, %v47_v0  ;;  %v97_v26 = vrot.slane %v423_v13, 1 }
  0x29   :  { %v46_v4 = vunpack.c.0.s8 %v45_v2  ;;  %v98_v27 = vrot.slane %v421_v10, 1  ;;  %v99_v28 = vrot.slane %v425_v14, 1  ;;  %v185_v53 = vrot.slane %v423_v13, 3  ;;  %s378_s8 = smov [#allocation7]  }
  0x2a   :  { %v80_v5 = vsub.s32 2, %v48_v3  ;;  %v72_v6 = vsub.s32 0, %v48_v3  ;;  %v76_v8 = vsub.s32 1, %v48_v3  ;;  %vm93_vm0 = vcmp.lt.s32.totalorder %v92_v23, 1  ;;  %s280_s9 = sshll.u32 %s378_s8, 4  ;;  %s281_s9 = int_to_ptr.vmem [resolvable:$true] %s280_s9 }
  0x2b   :  { %v419_v7 = vsub.s32 %v46_v4, %v48_v3  ;;  %vm140_vm1 = vcmp.lt.s32.totalorder %v92_v23, 2  ;;  %vm181_vm2 = vcmp.lt.s32.totalorder %v92_v23, 127  ;;  %v186_v56 = vrot.slane %v421_v10, 3  ;;  %s343_s10 = scalar_lea.vmem %s281_s9, 48  ;;  %s347_s11 = scalar_lea.vmem %s281_s9, 64 }
  0x2c   :  { %v81_v11 = vrot.slane %v36_v9, %v80_v5  ;;  %v73_v12 = vrot.slane %v36_v9, %v72_v6  ;;  %v77_v17 = vrot.slane %v36_v9, %v76_v8  ;;  %v187_v57 = vrot.slane %v425_v14, 3  ;;  %p344_p2 = scmp.ne.s32.totalorder %s281_s9, %s343_s10  ;;  %p348_p3 = scmp.lt.s32.totalorder %s281_s9, %s281_s9 }
  0x2d   :  { %v57_v16 = vrot.slane %v425_v14, %v419_v7  ;;  %v50_v18 = vrot.slane %v43_v15, %v419_v7  ;;  %vm228_vm3 = vcmp.lt.s32.totalorder %v92_v23, 126  ;;  %v234_v63 = vrot.slane %v425_v14, 4  ;;  %p349_p4 = scmp.lt.s32.totalorder %s347_s11, %s343_s10 }
  0x2e   :  { %89 = vrot.lane.b32.xlu1 %v81_v11, %s374_s1  ;;  %85 = vrot.lane.b32.xlu0 %v73_v12, %s374_s1  ;;  %v232_v3 = vrot.slane %v423_v13, 4  ;;  %v233_v4 = vrot.slane %v421_v10, 4  ;;  %vm271_vm4 = vcmp.lt.s32.totalorder %v47_v0, 384 }
  0x2f   :  { %v58_v19 = vcombine.low %v50_v18, %v57_v16  ;;  %p350_p5 = por %p349_p4, %p348_p3 }
  0x31   :  { %v65_v20 = vrot.slane %v58_v19, %v419_v7  ;;  %p351_p6 = pnand %p350_p5, %p344_p2 }
  0x32   :  { %134 = vrot.lane.b32.xlu1 %v73_v12, %s375_s5  ;;  %87 = vrot.lane.b32.xlu0 %v77_v17, %s374_s1 }
  0x33   :  { %v66_v21 = vcombine.high %v65_v20, %v65_v20 }
  0x35   :  { %v68_v22 = vmul.f32 %v66_v21, %v36_v9 }
  0x36   :  { %138 = vrot.lane.b32.xlu1 %v81_v11, %s375_s5  ;;  %136 = vrot.lane.b32.xlu0 %v77_v17, %s375_s5 }
  0x3a   :  { %177 = vrot.lane.b32.xlu1 %v77_v17, %s376_s6  ;;  %175 = vrot.lane.b32.xlu0 %v73_v12, %s376_s6 }
  0x3e   :  { %222 = vrot.lane.b32.xlu1 %v73_v12, %s377_s7  ;;  %179 = vrot.lane.b32.xlu0 %v81_v11, %s376_s6 }
  0x42   :  { %226 = vrot.lane.b32.xlu1 %v81_v11, %s377_s7  ;;  %224 = vrot.lane.b32.xlu0 %v77_v17, %s377_s7 }
  0xa0   :  { %v90_v24 = vpop.permute.xlu1 %89  ;;  %v86_v25 = vpop.permute.xlu0 %85 }
  0xa1   :  { %v96_v29 = vsel %vm93_vm0, %v90_v24, %v86_v25 }
  0xa2   :  { %v103_v34 = vmul.f32 %v97_v26, %v96_v29 }
  0xa4   :  { %v135_v30 = vpop.permute.xlu1 %134  ;;  %v88_v31 = vpop.permute.xlu0 %87 }
  0xa5   :  { %v94_v32 = vsel %vm93_vm0, %v88_v31, %v90_v24  ;;  %v95_v33 = vsel %vm93_vm0, %v86_v25, %v88_v31 }
  0xa6   :  { %v104_v35 = vmul.f32 %v98_v27, %v95_v33  ;;  %v105_v36 = vmul.f32 %v99_v28, %v94_v32 }
  0xa8   :  { %v109_v37 = vcombine.low %v103_v34, %v104_v35  ;;  %v123_v38 = vrot.slane %v105_v36, %v419_v7  ;;  %v139_v39 = vpop.permute.xlu1 %138  ;;  %v137_v40 = vpop.permute.xlu0 %136 }
  0xa9   :  { %v143_v41 = vsel %vm140_vm1, %v139_v39, %v135_v30  ;;  %v141_v42 = vsel %vm140_vm1, %v137_v40, %v139_v39  ;;  %v142_v43 = vsel %vm140_vm1, %v135_v30, %v137_v40 }
  0xaa   :  { %v116_v44 = vrot.slane %v109_v37, %v419_v7  ;;  %v144_v45 = vmul.f32 %v143_v41, %v423_v13  ;;  %v145_v46 = vmul.f32 %v142_v43, %v421_v10  ;;  %v146_v47 = vmul.f32 %v141_v42, %v425_v14 }
  0xac   :  { %v124_v48 = vcombine.low %v116_v44, %v123_v38  ;;  %v150_v49 = vcombine.low %v144_v45, %v145_v46  ;;  %v164_v50 = vrot.slane %v146_v47, %v419_v7  ;;  %v178_v51 = vpop.permute.xlu1 %177  ;;  %v176_v52 = vpop.permute.xlu0 %175 }
  0xad   :  { %v183_v58 = vsel %vm181_vm2, %v176_v52, %v178_v51 }
  0xae   :  { %v131_v54 = vrot.slane %v124_v48, %v419_v7  ;;  %v157_v55 = vrot.slane %v150_v49, %v419_v7  ;;  %v191_v6 = vmul.f32 %v185_v53, %v183_v58 }
  0xb0   :  { %v133_v59 = vadd.f32 %v131_v54, %v68_v22  ;;  %v165_v60 = vcombine.low %v157_v55, %v164_v50  ;;  %v223_v61 = vpop.permute.xlu1 %222  ;;  %v180_v62 = vpop.permute.xlu0 %179 }
  0xb1   :  { %v182_v1 = vsel %vm181_vm2, %v178_v51, %v180_v62  ;;  %v184_v2 = vsel %vm181_vm2, %v180_v62, %v176_v52 }
  0xb2   :  { %v172_v5 = vrot.slane %v165_v60, %v419_v7  ;;  %v192_v8 = vmul.f32 %v186_v56, %v182_v1  ;;  %v193_v9 = vmul.f32 %v187_v57, %v184_v2 }
  0xb4   :  { %v197_v11 = vcombine.low %v191_v6, %v192_v8  ;;  %v211_v12 = vrot.slane %v193_v9, %v419_v7  ;;  %v227_v15 = vpop.permute.xlu1 %226  ;;  %v225_v16 = vpop.permute.xlu0 %224  ;;  %v174_v17 = vadd.f32 %v172_v5, %v133_v59 }
  0xb5   :  { %v231_v18 = vsel %vm228_vm3, %v227_v15, %v223_v61  ;;  %v229_v14 = vsel %vm228_vm3, %v225_v16, %v227_v15  ;;  %v230_v19 = vsel %vm228_vm3, %v223_v61, %v225_v16 }
  0xb6   :  { %v204_v13 = vrot.slane %v197_v11, %v419_v7  ;;  %v240_v10 = vmul.f32 %v234_v63, %v231_v18  ;;  %v238_v20 = vmul.f32 %v232_v3, %v230_v19  ;;  %v239_v21 = vmul.f32 %v233_v4, %v229_v14 }
  0xb8   :  { %v212_v22 = vcombine.low %v204_v13, %v211_v12  ;;  %v258_v24 = vrot.slane %v240_v10, %v419_v7  ;;  %v244_v25 = vcombine.low %v238_v20, %v239_v21 }
  0xba   :  { %v219_v26 = vrot.slane %v212_v22, %v419_v7  ;;  %v251_v27 = vrot.slane %v244_v25, %v419_v7 }
  0xbc   :  { %v259_v28 = vcombine.low %v251_v27, %v258_v24  ;;  %v221_v29 = vadd.f32 %v219_v26, %v174_v17 }
  0xbe   :  { %v266_v23 = vrot.slane %v259_v28, %v419_v7 }
  0xc0   :  { %v268_v30 = vadd.f32 %v266_v23, %v221_v29 }
  0xc2   :  { %273 = vst.msk [vmem:[#allocation7] sm:$0x7] %vm271_vm4, %v268_v30 }
  0xc3   :  { %354 = shalt.err (!%p351_p6)
}
  0xc4   :  { %s355_s14 = scalar_lea.hbm %s476_s2, 48 }
  0xc5   :  { %p356_p7 = scmp.ne.s32.totalorder %s476_s2, %s355_s14  ;;  %p359_p8 = scmp.lt.u32.totalorder %s355_s14, %s476_s2 }
  0xc7   :  { %p361_p9 = pnand %p359_p8, %p356_p7 }
  0xc9   :  { %364 = shalt.err (!%p361_p9)
}
  0xca   :  { %283 = dma.vmem_to_hbm [thread:$0]  %s281_s9, 48, %s476_s2, [#allocation4]  }
  0xcb   :  { %369 = dma.done.wait [#allocation4], 48  }
  0xcc   :  { %370 = vsyncadd [#allocation4], 4294967248 }
  0xcd   :  { %287 = vsyncpa [#allocation3], 1 }
  0xce   :  { %288 = vsyncpa [#allocation6], 1 }
  0xcf   :  { %289 = vsyncpa [#allocation4], 1 }

</bundles_post_ra>
